<compile_context>
chip_gen: v7x
topology: tpu7x:2x2x1
jax: 0.10.0
libtpu: 0.0.40
codegen_flags: <defaults>
</compile_context>

<pallas_src>
import jax
import jax.numpy as jnp
from jax.experimental import pallas as pl
from jax.experimental.pallas import tpu as pltpu


def conv_relu_residual_kernel(x_ref, w_ref, b_ref, y_ref):
    # x_ref: (C, TL)  one lane tile of the flattened (C, N*L) input
    # w_ref: (C, C)   pointwise Conv1d weight (resident across the grid)
    # b_ref: (C, 1)   Conv1d bias             (resident across the grid)
    x = x_ref[...].astype(jnp.float32)
    w = w_ref[...].astype(jnp.float32)
    b = b_ref[...].astype(jnp.float32)
    # NOTE(v5e): casting w/x to bf16 here would be a 2-4x MXU win for large C,
    # but C is tiny (mem-bound kernel) and we keep fp32 for exact accuracy.
    y = jnp.dot(w, x, preferred_element_type=jnp.float32)  # one wide MXU push
    y = jnp.maximum(y + b, 0.0)                             # bias + ReLU (dropout p=0)
    y_ref[...] = (y + x).astype(y_ref.dtype)                # residual add


def _pick_lane_tile(total, target=512):
    """Largest multiple of 128 (<= target) dividing `total`; else the full extent."""
    if total % 128 == 0:
        t = min(target, total)
        t -= t % 128
        while t >= 128:
            if total % t == 0:
                return t
            t -= 128
    return total


def batch_norm_residual(x, w, b, gamma=None, beta=None):
    # gamma/beta are unused: the BN output is overwritten in the reference forward.
    del gamma, beta
    N, C, L = x.shape
    NL = N * L

    # Lane-dense layout: fold batch into the lane (last) axis.
    x2d = jnp.transpose(x, (1, 0, 2)).reshape(C, NL)

    tl = _pick_lane_tile(NL)
    grid = (NL // tl,)

    y2d = pl.pallas_call(
        conv_relu_residual_kernel,
        out_shape=jax.ShapeDtypeStruct((C, NL), x.dtype),
        grid_spec=pltpu.PrefetchScalarGridSpec(
            num_scalar_prefetch=0,
            grid=grid,
            in_specs=[
                pl.BlockSpec((C, tl), lambda j: (0, j)),  # x tile (pipelined)
                pl.BlockSpec((C, C), lambda j: (0, 0)),   # W resident
                pl.BlockSpec((C, 1), lambda j: (0, 0)),   # bias resident
            ],
            out_specs=pl.BlockSpec((C, tl), lambda j: (0, j)),
        ),
        compiler_params=pltpu.CompilerParams(
            dimension_semantics=("parallel",),            # no reduction axis; shardable on v7x
            vmem_limit_bytes=32 * 1024 * 1024,            # fits v7x (64 MiB phys) w/ 2x buffering
        ),
    )(x2d, w, b)

    return jnp.transpose(y2d.reshape(C, N, L), (1, 0, 2))


def reference_forward(x, w, b, gamma=None, beta=None):
    # Pure-JAX reproduction of the torch forward (BN result overwritten).
    y = jnp.einsum("oc,ncl->nol", w, x) + b[None, :, :]
    y = jnp.maximum(y, 0.0)
    return y + x


if __name__ == "__main__":
    key = jax.random.PRNGKey(0)
    kx, kw, kb = jax.random.split(key, 3)

    N, C, L = 2, 16, 64   # batch=2, n_features=16, seq_len=64
    x = jax.random.normal(kx, (N, C, L), dtype=jnp.float32)
    w = jax.random.normal(kw, (C, C), dtype=jnp.float32) * 0.1   # Conv1d(k=1) weight
    b = jax.random.normal(kb, (C, 1), dtype=jnp.float32) * 0.1   # Conv1d bias
    gamma = jnp.ones((C, 1), dtype=jnp.float32)                  # BN weight (unused: BN output discarded)
    beta = jnp.zeros((C, 1), dtype=jnp.float32)                  # BN bias   (unused: BN output discarded)

    out = batch_norm_residual(x, w, b, gamma, beta)
    out = jax.block_until_ready(out)

    ref = reference_forward(x, w, b)
    assert out.shape == (N, C, L) and out.dtype == x.dtype
    assert jnp.allclose(out, ref, atol=1e-5, rtol=1e-5), "mismatch vs reference"

    print("KERNEL_OK")
</pallas_src>

<mosaic_0001>
module attributes {stable_mosaic.version = 11 : i64} {
  func.func @conv_relu_residual_kernel(%arg0: i32, %arg1: memref<16x128xf32, #tpu.memory_space<vmem>>, %arg2: memref<16x16xf32, #tpu.memory_space<vmem>>, %arg3: memref<16x1xf32, #tpu.memory_space<vmem>>, %arg4: memref<16x128xf32, #tpu.memory_space<vmem>>) attributes {dimension_semantics = [#tpu.dimension_semantics<parallel>], iteration_bounds = array<i64: 1>, scalar_prefetch = 0 : i64, scratch_operands = 0 : i64, tpu.core_type = #tpu.core_type<tc>, window_params = [{transform_indices = @transform_0, window_bounds = array<i64: 16, 128>}, {pipeline_mode = #tpu.pipeline_mode<synchronous>, transform_indices = @transform_1, window_bounds = array<i64: 16, 16>}, {pipeline_mode = #tpu.pipeline_mode<synchronous>, transform_indices = @transform_2, window_bounds = array<i64: 16, 1>}, {transform_indices = @transform_3, window_bounds = array<i64: 16, 128>}]} {
    %c0 = arith.constant 0 : index
    %c0_0 = arith.constant 0 : index
    %0 = vector.load %arg1[%c0, %c0_0] : memref<16x128xf32, #tpu.memory_space<vmem>>, vector<16x128xf32>
    %c0_1 = arith.constant 0 : index
    %c0_2 = arith.constant 0 : index
    %1 = vector.load %arg2[%c0_1, %c0_2] : memref<16x16xf32, #tpu.memory_space<vmem>>, vector<16x16xf32>
    %c0_3 = arith.constant 0 : index
    %c0_4 = arith.constant 0 : index
    %2 = vector.load %arg3[%c0_3, %c0_4] : memref<16x1xf32, #tpu.memory_space<vmem>>, vector<16x1xf32>
    %cst = arith.constant dense<0.000000e+00> : vector<16x128xf32>
    %3 = tpu.matmul %1, %0, %cst {dimension_numbers = #tpu.dot_dimension_numbers<[1], [0], [0], [1], [0, 0, 1, 1], [], []>} : vector<16x16xf32>, vector<16x128xf32>, vector<16x128xf32> -> vector<16x128xf32>
    %4 = vector.broadcast %2 : vector<16x1xf32> to vector<16x128xf32>
    %5 = arith.addf %3, %4 : vector<16x128xf32>
    %cst_5 = arith.constant 0.000000e+00 : f32
    %6 = vector.broadcast %cst_5 : f32 to vector<16x128xf32>
    %7 = arith.maximumf %5, %6 : vector<16x128xf32>
    %8 = arith.addf %7, %0 : vector<16x128xf32>
    %c0_6 = arith.constant 0 : index
    %c0_7 = arith.constant 0 : index
    %9 = vector.load %arg4[%c0_6, %c0_7] : memref<16x128xf32, #tpu.memory_space<vmem>>, vector<16x128xf32>
    tpu.vector_store %arg4[%c0_6, %c0_7], %8 {strides = array<i32>} : memref<16x128xf32, #tpu.memory_space<vmem>>, vector<16x128xf32>,
    return
  }
  func.func @transform_0(%arg0: i32) -> (i32, i32) {
    %c0_i32 = arith.constant 0 : i32
    %c0_i32_0 = arith.constant 0 : i32
    return %c0_i32, %arg0 : i32, i32
  }
  func.func @transform_1(%arg0: i32) -> (i32, i32) {
    %c0_i32 = arith.constant 0 : i32
    %c0_i32_0 = arith.constant 0 : i32
    %c0_i32_1 = arith.constant 0 : i32
    return %c0_i32, %c0_i32_0 : i32, i32
  }
  func.func @transform_2(%arg0: i32) -> (i32, i32) {
    %c0_i32 = arith.constant 0 : i32
    %c0_i32_0 = arith.constant 0 : i32
    %c0_i32_1 = arith.constant 0 : i32
    return %c0_i32, %c0_i32_0 : i32, i32
  }
  func.func @transform_3(%arg0: i32) -> (i32, i32) {
    %c0_i32 = arith.constant 0 : i32
    %c0_i32_0 = arith.constant 0 : i32
    return %c0_i32, %arg0 : i32, i32
  }
}

</mosaic_0001>

<bundles_post_ra>
// kernel: tpu_custom_call.1
= control target key start
LH: loop header
LB: loop body
LE: loop exit
PB: predicated region body
PF: predicated region fallthrough
CT: control target
= control target key end

     0   :  { %8 = vsyncpa [#allocation3], 0  ;;  %s288_s0 = inlined_call_operand.vmem [shape: f32[16,128], index: 0, kind: input, shape index: {}]   ;;  %s289_s1 = inlined_call_operand.hbm [shape: f32[16,16], index: 1, kind: input, shape index: {}]   ;;  %s290_s2 = inlined_call_operand.vmem [shape: f32[16,1], index: 2, kind: input, shape index: {}]   ;;  %s291_s3 = inlined_call_operand.hbm [shape: f32[16,128], index: 3, kind: output, shape index: {}]  }
   0x1   :  { %9 = vsyncpa [#allocation4], 0  ;;  %s221_s12 = smov [#allocation2]   ;;  %s173_s16 = scalar_lea.hbm %s289_s1, 256 }
   0x2   :  { %s17_s13 = sshll.u32 %s221_s12, 4  ;;  %p174_p0 = scmp.ne.s32.totalorder %s289_s1, %s173_s16  ;;  %s18_s13 = int_to_ptr.vmem [resolvable:$true] %s17_s13 }
   0x3   :  { %p177_p1 = scmp.lt.u32.totalorder %s173_s16, %s289_s1 }
   0x5   :  { %p179_p2 = pnand %p177_p1, %p174_p0 }
   0x7   :  { %182 = shalt.err (!%p179_p2)
}
   0x8   :  { %s183_s21 = scalar_lea.vmem %s18_s13, 256  ;;  %p188_p4 = scmp.lt.s32.totalorder %s18_s13, %s18_s13 }
   0x9   :  { %p184_p3 = scmp.ne.s32.totalorder %s18_s13, %s183_s21  ;;  %p189_p5 = scmp.lt.s32.totalorder %s183_s21, %s183_s21 }
   0xb   :  { %p190_p6 = por %p189_p5, %p188_p4 }
   0xd   :  { %p191_p7 = pnand %p190_p6, %p184_p3 }
   0xf   :  { %194 = shalt.err (!%p191_p7)
}
  0x10   :  { %s222_s22 = smov 128   ;;  %s223_s23 = smov 8  }
  0x11   :  { %23 = dma.hbm_to_vmem [thread:$0]  %s289_s1, 256, %s18_s13, [#allocation3], %s222_s22, %s222_s22, %s223_s23  }
  0x12   :  { %217 = dma.done.wait [#allocation3], 256  }
  0x13   :  { %218 = vsyncadd [#allocation3], 4294967040  ;;  %v224_v0 = vmov 0   ;;  %vm45_vm0 = vcmask 130048   ;;  %v29_v1 = vld [vmem:[%s288_s0] sm:$0xff]  ;;  %v30_v2 = vld [vmem:[%s288_s0 + $0x8] sm:$0xff] }
  0x14   :  { %172 = vset.pattern.permute.xlu0 %v224_v0  ;;  %v31_v3 = vld [vmem:[#allocation2] sm:$0xff]  ;;  %v163_v4 = vpack.c.bf16 %v30_v2, %v29_v1  ;;  %v34_v6 = vld [vmem:[%s290_s2 + $0x8] sm:$0xff]  ;;  %s225_s0 = smov [#allocation5]  }
  0x15   :  { %160 = vmatprep.mubr.msk.f32.mxu0 %vm45_vm0, %v31_v3  ;;  %v33_v5 = vld [vmem:[%s290_s2] sm:$0xff]  ;;  %v32_v7 = vld [vmem:[#allocation2 + $0x8] sm:$0xff]  ;;  %s138_s6 = sshll.u32 %s225_s0, 4  ;;  %s139_s6 = int_to_ptr.vmem [resolvable:$true] %s138_s6 }
  0x16   :  { %37 = vperm.xlu0 %172, %v33_v5   ;;  %164 = vmatprep.subr.bf16.mxu0 %v163_v4  ;;  %s195_s2 = scalar_lea.vmem %s139_s6, 256  ;;  %p200_p9 = scmp.lt.s32.totalorder %s139_s6, %s139_s6 }
  0x17   :  { %166 = vmatpush3.bf16.msra.mxu0 %v163_v4  ;;  %p196_p8 = scmp.ne.s32.totalorder %s139_s6, %s195_s2  ;;  %p201_p10 = scmp.lt.s32.totalorder %s195_s2, %s195_s2 }
  0x19   :  { %p202_p11 = por %p201_p10, %p200_p9 }
  0x1a   :  { %42 = vperm.xlu0 %172, %v34_v6   ;;  %161 = vmatmul.mubr.msk.f32.vlgmr.msra.gmra.mrb[0].mxu0 %vm45_vm0, %v32_v7 }
  0x1b   :  { %p203_p12 = pnand %p202_p11, %p196_p8 }
  0x95   :  { %v38_v8 = vpop.permute.xlu0 %37 }
  0x99   :  { %v43_v9 = vpop.permute.xlu0 %42 }
  0xed   :  { %v162_v10 = vpop.f32.mrb[0].mxu0 }
  0xee   :  { %v124_v11 = vadd.f32 %v162_v10, %v43_v9  ;;  %v118_v12 = vpop.f32.mrb[1].mxu0 }
  0xef   :  { %v119_v13 = vadd.f32 %v118_v12, %v38_v8 }
  0xf0   :  { %v128_v14 = vmax.f32 %v124_v11, 0.0 }
  0xf1   :  { %v127_v15 = vmax.f32 %v119_v13, 0.0 }
  0xf2   :  { %v130_v16 = vadd.f32 %v128_v14, %v30_v2 }
  0xf3   :  { %v129_v17 = vadd.f32 %v127_v15, %v29_v1 }
  0xf4   :  { %132 = vst [vmem:[#allocation5 + $0x8] sm:$0xff] %v130_v16 }
  0xf5   :  { %131 = vst [vmem:[#allocation5] sm:$0xff] %v129_v17 }
  0xf6   :  { %206 = shalt.err (!%p203_p12)
}
  0xf7   :  { %s207_s9 = scalar_lea.hbm %s291_s3, 256 }
  0xf8   :  { %p208_p13 = scmp.ne.s32.totalorder %s291_s3, %s207_s9  ;;  %p211_p0 = scmp.lt.u32.totalorder %s207_s9, %s291_s3 }
  0xfa   :  { %p213_p1 = pnand %p211_p0, %p208_p13 }
  0xfc   :  { %216 = shalt.err (!%p213_p1)
}
  0xfd   :  { %144 = dma.vmem_to_hbm [thread:$0]  %s139_s6, 256, %s291_s3, [#allocation4], %s222_s22, %s222_s22, %s223_s23  }
  0xfe   :  { %219 = dma.done.wait [#allocation4], 256  }
  0xff   :  { %220 = vsyncadd [#allocation4], 4294967040 }
 0x100   :  { %148 = vsyncpa [#allocation3], 1 }
 0x101   :  { %149 = vsyncpa [#allocation4], 1 }

</bundles_post_ra>
